<compile_context>
chip_gen: v5e
topology: v5e:2x2
jax: 0.10.0
libtpu: 0.0.40
codegen_flags: <defaults>
</compile_context>

<pallas_src>
import jax
import jax.numpy as jnp
from jax.experimental import pallas as pl
from jax.experimental.pallas import tpu as pltpu


# ---------------------------------------------------------------------------
# Helpers
# ---------------------------------------------------------------------------
def _round_up(n, m):
    return ((n + m - 1) // m) * m


def _pick_tile(n, cap, align):
    """Largest `align`-aligned divisor of n that is <= cap.

    `n` is always a multiple of `align` here (we pad N to a multiple of 128),
    so this never falls back to the whole axis.
    """
    if n <= cap:
        return n
    start = cap - (cap % align)
    for t in range(start, 0, -align):
        if n % t == 0:
            return t
    return align


# ---------------------------------------------------------------------------
# Fused kernel: for one (row-tile i, k-tile) pair
#   h_k   = x[k-tile] @ W^T + b          (bf16 x / W^T, f32 accumulate, + bias)
#   acc  += adj[i-tile, k-tile] @ h_k    (bf16 operands, f32 VMEM accumulator)
# and write out on the last k step.
# ---------------------------------------------------------------------------
def fused_gcn_kernel(adj_ref, x_ref, wt_ref, b_ref, out_ref, acc_ref):
    k = pl.program_id(1)

    @pl.when(k == 0)
    def _():
        acc_ref[...] = jnp.zeros_like(acc_ref)

    # On-the-fly feature transform for this k-tile of nodes (recompute fusion).
    h = jnp.dot(x_ref[...], wt_ref[...], preferred_element_type=jnp.float32)
    h = h + b_ref[...]                       # bias broadcast, f32

    # Graph aggregation: bf16 operands on the MXU, f32 accumulation.
    acc_ref[...] += jnp.dot(adj_ref[...], h.astype(adj_ref.dtype),
                            preferred_element_type=jnp.float32)

    @pl.when(k == pl.num_programs(1) - 1)
    def _():
        out_ref[...] = acc_ref[...].astype(out_ref.dtype)


# ---------------------------------------------------------------------------
# Wrapper: out = adj @ (x @ W^T + b)
# ---------------------------------------------------------------------------
def g_gcn_layer(x, adj, w_t, b, *, max_tm=1024, max_tk=2048):
    N, n_in = x.shape
    n_out = w_t.shape[1]
    out_dtype = x.dtype

    # --- Padding: lane-dense output (n_out -> 128k), clean N tiling --------
    N_pad = _round_up(N, 128)
    n_out_pad = _round_up(n_out, 128)

    adj_p = jnp.pad(adj.astype(jnp.bfloat16),
                    ((0, N_pad - N), (0, N_pad - N)))
    x_p = jnp.pad(x.astype(jnp.bfloat16), ((0, N_pad - N), (0, 0)))
    wt_p = jnp.pad(w_t.astype(jnp.bfloat16), ((0, 0), (0, n_out_pad - n_out)))
    b_p = jnp.pad(b.reshape(1, n_out).astype(jnp.float32),
                  ((0, 0), (0, n_out_pad - n_out)))

    # --- Tile selection -----------------------------------------------------
    # Row tile: 16-aligned (bf16 sublane packing), capped at N_pad//2 so the
    # "parallel" row axis has >= 2 steps (keeps both v7x TensorCores busy).
    tm = _pick_tile(N_pad, min(max_tm, max(N_pad // 2, 16)), 16)
    # Contraction tile: 128-aligned (adj lane dim / x sublane dim).
    tk = _pick_tile(N_pad, max_tk, 128)
    grid = (N_pad // tm, N_pad // tk)

    flops = (2 * N_pad * N_pad * n_out_pad                       # aggregation
             + 2 * grid[0] * N_pad * n_in * n_out_pad)           # fused linear (recomputed per row tile)
    bytes_accessed = (2 * N_pad * N_pad                          # adj (bf16)
                      + 2 * grid[0] * N_pad * n_in               # x re-read per row tile (bf16)
                      + 2 * n_in * n_out_pad + 4 * n_out_pad     # W^T, bias
                      + 4 * N_pad * n_out_pad)                   # out (f32)

    out_p = pl.pallas_call(
        fused_gcn_kernel,
        out_shape=jax.ShapeDtypeStruct((N_pad, n_out_pad), out_dtype),
        grid=grid,
        in_specs=[
            pl.BlockSpec((tm, tk), lambda i, k: (i, k)),            # adj block
            pl.BlockSpec((tk, n_in), lambda i, k: (k, 0)),          # x block
            pl.BlockSpec((n_in, n_out_pad), lambda i, k: (0, 0)),   # W^T (invariant, VMEM-resident)
            pl.BlockSpec((1, n_out_pad), lambda i, k: (0, 0)),      # bias (invariant)
        ],
        out_specs=pl.BlockSpec((tm, n_out_pad), lambda i, k: (i, 0)),  # resident across k
        scratch_shapes=[pltpu.VMEM((tm, n_out_pad), jnp.float32)],     # f32 accumulator
        compiler_params=pltpu.CompilerParams(
            dimension_semantics=("parallel", "arbitrary"),
            vmem_limit_bytes=48 * 1024 * 1024),
        cost_estimate=pl.CostEstimate(flops=flops, transcendentals=0,
                                      bytes_accessed=bytes_accessed),
    )(adj_p, x_p, wt_p, b_p)

    # Strip padding.
    return out_p[:N, :n_out]


if __name__ == "__main__":
    # Small shapes consistent with the module: N nodes, n_in -> n_out features.
    N, n_in, n_out = 128, 32, 64

    key = jax.random.PRNGKey(0)
    kx, kadj, kw, kb = jax.random.split(key, 4)

    x = jax.random.normal(kx, (N, n_in), dtype=jnp.float32)

    # Dense adjacency (stand-in for the sparse adj in torch.sparse.mm),
    # deterministic sparse-ish pattern with row normalization.
    adj_mask = (jax.random.uniform(kadj, (N, N)) < 0.1).astype(jnp.float32)
    adj = adj_mask / jnp.maximum(adj_mask.sum(axis=1, keepdims=True), 1.0)

    # nn.Linear(n_in, n_out) init: U(-1/sqrt(n_in), 1/sqrt(n_in)) for W and b.
    bound = 1.0 / (n_in ** 0.5)
    w = jax.random.uniform(kw, (n_out, n_in), minval=-bound, maxval=bound,
                           dtype=jnp.float32)   # PyTorch layout [n_out, n_in]
    b = jax.random.uniform(kb, (n_out,), minval=-bound, maxval=bound,
                           dtype=jnp.float32)

    w_t = w.T                                   # [n_in, n_out] for x @ W^T

    out = g_gcn_layer(x, adj, w_t, b)
    out = jax.block_until_ready(out)

    # Pure-JAX f32 reference of the PyTorch forward: adj @ (x @ W^T + b).
    ref = adj @ (x @ w_t + b.reshape(1, n_out))
    assert out.shape == (N, n_out)
    # bf16 matmul operands with f32 accumulation -> looser tolerance than f32.
    err = float(jnp.max(jnp.abs(out - ref)))
    assert jnp.allclose(out, ref, atol=2e-2, rtol=2e-2), f"max abs err {err}"

    print("KERNEL_OK")
</pallas_src>

<mosaic_0001>
module attributes {stable_mosaic.version = 11 : i64} {
  func.func @fused_gcn_kernel(%arg0: i32, %arg1: i32, %arg2: memref<64x128xbf16, #tpu.memory_space<vmem>>, %arg3: memref<128x32xbf16, #tpu.memory_space<vmem>>, %arg4: memref<32x128xbf16, #tpu.memory_space<vmem>>, %arg5: memref<1x128xf32, #tpu.memory_space<vmem>>, %arg6: memref<64x128xf32, #tpu.memory_space<vmem>>, %arg7: memref<64x128xf32, #tpu.memory_space<vmem>>) attributes {dimension_semantics = [#tpu.dimension_semantics<parallel>, #tpu.dimension_semantics<arbitrary>], iteration_bounds = array<i64: 2, 1>, scalar_prefetch = 0 : i64, scratch_operands = 1 : i64, tpu.core_type = #tpu.core_type<tc>, window_params = [{transform_indices = @transform_0, window_bounds = array<i64: 64, 128>}, {transform_indices = @transform_1, window_bounds = array<i64: 128, 32>}, {pipeline_mode = #tpu.pipeline_mode<synchronous>, transform_indices = @transform_2, window_bounds = array<i64: 32, 128>}, {pipeline_mode = #tpu.pipeline_mode<synchronous>, transform_indices = @transform_3, window_bounds = array<i64: 1, 128>}, {transform_indices = @transform_4, window_bounds = array<i64: 64, 128>}]} {
    %c0_i32 = arith.constant 0 : i32
    %0 = arith.cmpi eq, %arg1, %c0_i32 : i32
    %1 = arith.extui %0 : i1 to i32
    %c0_i32_0 = arith.constant 0 : i32
    %2 = arith.cmpi ne, %1, %c0_i32_0 : i32
    scf.if %2 {
      %cst_15 = arith.constant 0.000000e+00 : f32
      %18 = vector.broadcast %cst_15 : f32 to vector<64x128xf32>
      %c0_16 = arith.constant 0 : index
      %c0_17 = arith.constant 0 : index
      %19 = vector.load %arg7[%c0_16, %c0_17] : memref<64x128xf32, #tpu.memory_space<vmem>>, vector<64x128xf32>
      tpu.vector_store %arg7[%c0_16, %c0_17], %18 {strides = array<i32>} : memref<64x128xf32, #tpu.memory_space<vmem>>, vector<64x128xf32>,
    } else {
    }
    %c0 = arith.constant 0 : index
    %c0_1 = arith.constant 0 : index
    %3 = vector.load %arg3[%c0, %c0_1] : memref<128x32xbf16, #tpu.memory_space<vmem>>, vector<128x32xbf16>
    %c0_2 = arith.constant 0 : index
    %c0_3 = arith.constant 0 : index
    %4 = vector.load %arg4[%c0_2, %c0_3] : memref<32x128xbf16, #tpu.memory_space<vmem>>, vector<32x128xbf16>
    %cst = arith.constant dense<0.000000e+00> : vector<128x128xf32>
    %5 = tpu.matmul %3, %4, %cst {dimension_numbers = #tpu.dot_dimension_numbers<[1], [0], [0], [1], [0, 0, 1, 1], [], []>} : vector<128x32xbf16>, vector<32x128xbf16>, vector<128x128xf32> -> vector<128x128xf32>
    %c0_4 = arith.constant 0 : index
    %c0_5 = arith.constant 0 : index
    %6 = vector.load %arg5[%c0_4, %c0_5] : memref<1x128xf32, #tpu.memory_space<vmem>>, vector<1x128xf32>
    %7 = vector.broadcast %6 : vector<1x128xf32> to vector<128x128xf32>
    %8 = arith.addf %5, %7 : vector<128x128xf32>
    %c0_6 = arith.constant 0 : index
    %c0_7 = arith.constant 0 : index
    %9 = vector.load %arg7[%c0_6, %c0_7] : memref<64x128xf32, #tpu.memory_space<vmem>>, vector<64x128xf32>
    %c0_8 = arith.constant 0 : index
    %c0_9 = arith.constant 0 : index
    %10 = vector.load %arg2[%c0_8, %c0_9] : memref<64x128xbf16, #tpu.memory_space<vmem>>, vector<64x128xbf16>
    %11 = arith.truncf %8 : vector<128x128xf32> to vector<128x128xbf16>
    %cst_10 = arith.constant dense<0.000000e+00> : vector<64x128xf32>
    %12 = tpu.matmul %10, %11, %cst_10 {dimension_numbers = #tpu.dot_dimension_numbers<[1], [0], [0], [1], [0, 0, 1, 1], [], []>} : vector<64x128xbf16>, vector<128x128xbf16>, vector<64x128xf32> -> vector<64x128xf32>
    %13 = arith.addf %9, %12 : vector<64x128xf32>
    %c0_11 = arith.constant 0 : index
    %c0_12 = arith.constant 0 : index
    %14 = vector.load %arg7[%c0_11, %c0_12] : memref<64x128xf32, #tpu.memory_space<vmem>>, vector<64x128xf32>
    tpu.vector_store %arg7[%c0_11, %c0_12], %13 {strides = array<i32>} : memref<64x128xf32, #tpu.memory_space<vmem>>, vector<64x128xf32>,
    %c0_i32_13 = arith.constant 0 : i32
    %15 = arith.cmpi eq, %arg1, %c0_i32_13 : i32
    %16 = arith.extui %15 : i1 to i32
    %c0_i32_14 = arith.constant 0 : i32
    %17 = arith.cmpi ne, %16, %c0_i32_14 : i32
    scf.if %17 {
      %c0_15 = arith.constant 0 : index
      %c0_16 = arith.constant 0 : index
      %18 = vector.load %arg7[%c0_15, %c0_16] : memref<64x128xf32, #tpu.memory_space<vmem>>, vector<64x128xf32>
      %c0_17 = arith.constant 0 : index
      %c0_18 = arith.constant 0 : index
      %19 = vector.load %arg6[%c0_17, %c0_18] : memref<64x128xf32, #tpu.memory_space<vmem>>, vector<64x128xf32>
      tpu.vector_store %arg6[%c0_17, %c0_18], %18 {strides = array<i32>} : memref<64x128xf32, #tpu.memory_space<vmem>>, vector<64x128xf32>,
    } else {
    }
    return
  }
  func.func @transform_0(%arg0: i32, %arg1: i32) -> (i32, i32) {
    %c0_i32 = arith.constant 0 : i32
    return %arg0, %arg1 : i32, i32
  }
  func.func @transform_1(%arg0: i32, %arg1: i32) -> (i32, i32) {
    %c0_i32 = arith.constant 0 : i32
    %c0_i32_0 = arith.constant 0 : i32
    return %arg1, %c0_i32 : i32, i32
  }
  func.func @transform_2(%arg0: i32, %arg1: i32) -> (i32, i32) {
    %c0_i32 = arith.constant 0 : i32
    %c0_i32_0 = arith.constant 0 : i32
    %c0_i32_1 = arith.constant 0 : i32
    return %c0_i32, %c0_i32_0 : i32, i32
  }
  func.func @transform_3(%arg0: i32, %arg1: i32) -> (i32, i32) {
    %c0_i32 = arith.constant 0 : i32
    %c0_i32_0 = arith.constant 0 : i32
    %c0_i32_1 = arith.constant 0 : i32
    return %c0_i32, %c0_i32_0 : i32, i32
  }
  func.func @transform_4(%arg0: i32, %arg1: i32) -> (i32, i32) {
    %c0_i32 = arith.constant 0 : i32
    %c0_i32_0 = arith.constant 0 : i32
    return %arg0, %c0_i32 : i32, i32
  }
}

</mosaic_0001>

<bundles_post_ra>
// kernel: tpu_custom_call.1
= control target key start
LH: loop header
LB: loop body
LE: loop exit
PB: predicated region body
PF: predicated region fallthrough
CT: control target
= control target key end

     0   :  { %9 = vsyncpa [#allocation4], 0  ;;  %s1020_s0 = inlined_call_operand.vmem [shape: bf16[128,128], index: 0, kind: input, shape index: {}]   ;;  %s1021_s1 = inlined_call_operand.vmem [shape: bf16[128,32], index: 1, kind: input, shape index: {}]   ;;  %s1022_s2 = inlined_call_operand.vmem [shape: bf16[32,128], index: 2, kind: input, shape index: {}]   ;;  %s1023_s3 = inlined_call_operand.vmem [shape: f32[1,128], index: 3, kind: input, shape index: {}]   ;;  %s1024_s4 = inlined_call_operand.hbm [shape: f32[128,128], index: 4, kind: output, shape index: {}]  }
   0x1   :  { %11 = vsyncpa [#allocation4 + $0x1], 0  ;;  %s891_s15 = smov 0   ;;  %s893_s16 = smov 0  }
   0x2   :  { %s895_s17 = smov 0   ;;  %s897_s18 = smov 0  }
   0x3   :  { %s899_s19 = smov 0   ;;  %s901_s20 = smov 0  }
   0x4 LB: > { %s623_s21 = sadd.s32 4294967295, %s862_s20   ;;  %s624_s22 = sadd.s32 4294967294, %s862_s20   ;;  %s862_s20 = sphi %s901_s20, %s17_s20   ;;  %s858_s19 = sphi %s899_s19, %s1031_s19   ;;  %s854_s18 = sphi %s897_s18, %s1030_s18   ;;  %s850_s17 = sphi %s895_s17, %s1029_s17   ;;  %s846_s16 = sphi %s893_s16, %s1028_s16   ;;  %s842_s15 = sphi %s891_s15, %s1027_s15  }
   0x5   : > { %s29_s23 = sadd.s32 1, %s858_s19  ;;  %s132_s24 = sadd.s32 1, %s850_s17 }
   0x6   : > { %p31_p0 = scmp.ge.s32.totalorder %s29_s23, 2  ;;  %p142_p1 = scmp.ne.s32.totalorder %s850_s17, %s846_s16 }
   0x7   : > { %p143_p2 = scmp.eq.s32.totalorder %s623_s21, 1  ;;  %p148_p3 = scmp.ne.s32.totalorder %s846_s16, %s842_s15 }
   0x8   : > { %s1033_s23 = smov (%p31_p0, %s29_s23), 0  ;;  %p149_p5 = scmp.eq.s32.totalorder %s624_s22, 1 }
   0x9   : > { %p931_p4 = por %p143_p2, %p142_p1  ;;  %s129_s26 = ssub.s32 %s858_s19, %s1033_s23 }
   0xa   : > { %p628_p6 = scmp.ge.s32.totalorder %s862_s20, 1  ;;  %p130_p7 = scmp.eq.s32.totalorder %s129_s26, 0 }
   0xb   : > { %p938_p8 = por %p149_p5, %p148_p3  ;;  %p194_p9 = scmp.lt.s32.totalorder %s862_s20, 3 }
   0xc   : > { %s944_s28 = scalar_select %p130_p7, %s850_s17, %s132_s24  }
   0xd   : > { %p195_p10 = pnand %p628_p6, %p194_p9 }
   0xe   : > { %s630_s9 = sshll.u32 (!%p195_p10), %s854_s18, 3  ;;  %s225_s14 = sand.u32 (!%p195_p10), 1, %s846_s16  }
   0xf   : > { %198 = sbr.rel (%p195_p10) target bundleno = 427 (0x1ab), region = 36  ;;  %p229_p11 = scmp.lt.s32.totalorder (!%p195_p10), %s630_s9, 15 }
  0x10   : > { %s629_s21 = sshll.u32 (!%p195_p10), %s225_s14, 6  ;;  %s715_s24 = sshll.u32 (!%p195_p10), %s854_s18, 6 }
  0x11   : > { %s227_s22 = scalar_lea.vmem (!%p195_p10), [#allocation3], %s629_s21  ;;  %s531_s30 = scalar_lea.hbm (!%p195_p10), %s1024_s4, %s715_s24 }
  0x12   : > { %s532_s5 = sshll.u32 (!%p195_p10), %s227_s22, 4  ;;  %s534_s6 = sshll.u32 (!%p195_p10), %s531_s30, 4  ;;  %s533_s5 = int_to_ptr.vmem [resolvable:$true] %s532_s5  ;;  %s535_s6 = int_to_ptr.hbm [resolvable:$true] %s534_s6 }
  0x13   : > { %s520_s7 = scalar_lea.sflag (!%p195_p10), [#allocation4], %s225_s14  ;;  %s798_s8 = sshra.s32 (!%p195_p10), %s535_s6, 4  ;;  %s799_s8 = int_to_ptr.hbm [resolvable:$true] %s798_s8 }
  0x14   : > { %v710_v0 = vld [vmem:[%s1022_s2 + $0x8] sm:$0xff]  ;;  %v709_v1 = vld [vmem:[%s1022_s2] sm:$0xff]  ;;  %vm333_vm0 = vcmask 261120   ;;  %v707_v6 = vld [vmem:[%s1021_s1 + $0x30] sm:$0xff]  ;;  %s1035_s9 = smov (!%p229_p11, %s630_s9), 15  ;;  %s804_s11 = scalar_lea.hbm %s1024_s4, 128 }
  0x15   : > { %716 = vmatpush.bf16.msra.mxu2 %v710_v0  ;;  %364 = vmatpush.bf16.msra.mxu0 %v710_v0  ;;  %v705_v2 = vld [vmem:[%s1021_s1 + $0x20] sm:$0xff]  ;;  %v706_v4 = vld [vmem:[%s1021_s1 + $0x28] sm:$0xff]  ;;  %v703_v7 = vld [vmem:[%s1021_s1 + $0x10] sm:$0xff]  ;;  %s631_s10 = sshll.u32 %s1035_s9, 2  ;;  %s800_s9 = scalar_lea.hbm %s799_s8, 64 }
  0x16   : > { %v701_v3 = vld [vmem:[%s1021_s1] sm:$0xff]  ;;  %v702_v5 = vld [vmem:[%s1021_s1 + $0x8] sm:$0xff]  ;;  %v708_v8 = vld [vmem:[%s1021_s1 + $0x38] sm:$0xff]  ;;  %s235_s13 = scalar_lea.vmem %s1020_s0, %s631_s10  ;;  %p801_p12 = scmp.ne.s32.totalorder %s799_s8, %s800_s9 }
  0x17   : > { %v704_v9 = vld [vmem:[%s1021_s1 + $0x18] sm:$0xff]  ;;  %v783_v23 = vld [vmem:[%s1023_s3] ss:$0 sm:$0xff]  ;;  %v712_v51 = vld [vmem:[%s235_s13 + $0x8] sm:$0xff]  ;;  %p805_p1 = scmp.lt.s32.totalorder %s799_s8, %s1024_s4  ;;  %p806_p2 = scmp.lt.s32.totalorder %s804_s11, %s800_s9 }
  0x18   : > { %v711_v52 = vld [vmem:[%s235_s13] sm:$0xff]  ;;  %v713_v53 = vld [vmem:[%s235_s13 + $0x10] sm:$0xff]  ;;  %v714_v54 = vld [vmem:[%s235_s13 + $0x18] sm:$0xff]  ;;  %p802_p13 = pnand %p801_p12, %p931_p4 }
  0x19   : > { %717 = vmatpush.bf16.msra.mxu2 %v709_v1  ;;  %365 = vmatpush.bf16.msra.mxu0 %v709_v1  ;;  %p807_p3 = por %p806_p2, %p805_p1 }
  0x1a   : > { %p803_p0 = pneg %p802_p13 }
  0x1c   : > { %676 = vmatmul.msk.bf16.vlgmr.msra.gmra.mxu2 %vm333_vm0, %v705_v2  ;;  %672 = vmatmul.msk.bf16.vlgmr.msra.gmra.mxu0 %vm333_vm0, %v701_v3  ;;  %p808_p5 = pnand %p807_p3, %p803_p0 }
  0x2c   : > { %677 = vmatmul.msk.bf16.gmra.mxu2 %vm333_vm0, %v706_v4  ;;  %673 = vmatmul.msk.bf16.gmra.mxu0 %vm333_vm0, %v702_v5 }
  0x3c   : > { %678 = vmatmul.msk.bf16.gmra.mxu2 %vm333_vm0, %v707_v6  ;;  %674 = vmatmul.msk.bf16.gmra.mxu0 %vm333_vm0, %v703_v7 }
  0x4c   : > { %679 = vmatmul.msk.bf16.gmra.mxu2 %vm333_vm0, %v708_v8  ;;  %675 = vmatmul.msk.bf16.gmra.mxu0 %vm333_vm0, %v704_v9 }
  0x99   : > { %v367_v10 = vpop.f32.mrf.mxu0 }
  0x9a   : > { %v368_v47 = vadd.f32 %v783_v23, %v367_v10 }
  0x9f   : > { %v387_v11 = vpop.f32.mrf.mxu2 }
  0xa0   : > { %v388_v37 = vadd.f32 %v783_v23, %v387_v11 }
  0xa1   : > { %v369_v13 = vpop.f32.mrf.mxu0 }
  0xa2   : > { %v370_v48 = vadd.f32 %v783_v23, %v369_v13 }
  0xa4   : > { %v423_v50 = vpack.c.bf16 %v370_v48, %v368_v47 }
  0xa7   : > { %v389_v12 = vpop.f32.mrf.mxu2 }
  0xa8   : > { %v390_v34 = vadd.f32 %v783_v23, %v389_v12 }
  0xa9   : > { %v372_v15 = vpop.f32.mrf.mxu0 }
  0xaa   : > { %v427_v40 = vpack.c.bf16 %v390_v34, %v388_v37  ;;  %v373_v44 = vadd.f32 %v783_v23, %v372_v15 }
  0xaf   : > { %v392_v14 = vpop.f32.mrf.mxu2 }
  0xb0   : > { %v393_v33 = vadd.f32 %v783_v23, %v392_v14 }
  0xb1   : > { %v374_v17 = vpop.f32.mrf.mxu0 }
  0xb2   : > { %v375_v45 = vadd.f32 %v783_v23, %v374_v17 }
  0xb4   : > { %v424_v49 = vpack.c.bf16 %v375_v45, %v373_v44 }
  0xb7   : > { %v394_v16 = vpop.f32.mrf.mxu2 }
  0xb8   : > { %v395_v31 = vadd.f32 %v783_v23, %v394_v16 }
  0xb9   : > { %v377_v19 = vpop.f32.mrf.mxu0 }
  0xba   : > { %v428_v35 = vpack.c.bf16 %v395_v31, %v393_v33  ;;  %v378_v41 = vadd.f32 %v783_v23, %v377_v19 }
  0xbf   : > { %v397_v18 = vpop.f32.mrf.mxu2 }
  0xc0   : > { %v398_v30 = vadd.f32 %v783_v23, %v397_v18 }
  0xc1   : > { %v379_v21 = vpop.f32.mrf.mxu0 }
  0xc2   : > { %v380_v42 = vadd.f32 %v783_v23, %v379_v21 }
  0xc4   : > { %v425_v46 = vpack.c.bf16 %v380_v42, %v378_v41 }
  0xc7   : > { %v399_v20 = vpop.f32.mrf.mxu2 }
  0xc8   : > { %v400_v28 = vadd.f32 %v783_v23, %v399_v20 }
  0xc9   : > { %v382_v27 = vpop.f32.mrf.mxu0 }
  0xca   : > { %v429_v32 = vpack.c.bf16 %v400_v28, %v398_v30  ;;  %v383_v38 = vadd.f32 %v783_v23, %v382_v27 }
  0xcf   : > { %v402_v22 = vpop.f32.mrf.mxu2 }
  0xd0   : > { %v403_v25 = vadd.f32 %v783_v23, %v402_v22 }
  0xd1   : > { %v384_v36 = vpop.f32.mrf.mxu0 }
  0xd2   : > { %v385_v39 = vadd.f32 %v783_v23, %v384_v36 }
  0xd4   : > { %v426_v43 = vpack.c.bf16 %v385_v39, %v383_v38 }
  0xd7   : > { %v404_v24 = vpop.f32.mrf.mxu2 }
  0xd8   : > { %v405_v26 = vadd.f32 %v783_v23, %v404_v24 }
  0xda   : > { %v430_v29 = vpack.c.bf16 %v405_v26, %v403_v25 }
  0xdc   : > { %455 = vmatpush.bf16.msra.mxu1 %v430_v29  ;;  %718 = vmatpush.bf16.msra.mxu3 %v430_v29 }
  0xe0   : > { %456 = vmatpush.bf16.msra.mxu1 %v429_v32  ;;  %719 = vmatpush.bf16.msra.mxu3 %v429_v32 }
  0xe4   : > { %457 = vmatpush.bf16.msra.mxu1 %v428_v35  ;;  %720 = vmatpush.bf16.msra.mxu3 %v428_v35 }
  0xe8   : > { %458 = vmatpush.bf16.msra.mxu1 %v427_v40  ;;  %721 = vmatpush.bf16.msra.mxu3 %v427_v40 }
  0xec   : > { %459 = vmatpush.bf16.msra.mxu1 %v426_v43  ;;  %722 = vmatpush.bf16.msra.mxu3 %v426_v43 }
  0xf0   : > { %460 = vmatpush.bf16.msra.mxu1 %v425_v46  ;;  %723 = vmatpush.bf16.msra.mxu3 %v425_v46 }
  0xf4   : > { %461 = vmatpush.bf16.msra.mxu1 %v424_v49  ;;  %724 = vmatpush.bf16.msra.mxu3 %v424_v49 }
  0xf8   : > { %462 = vmatpush.bf16.msra.mxu1 %v423_v50  ;;  %725 = vmatpush.bf16.msra.mxu3 %v423_v50 }
  0xfb   : > { %468 = vmatmul.bf16.vlgmr.msra.gmra.mxu3 %v712_v51  ;;  %463 = vmatmul.bf16.vlgmr.msra.gmra.mxu1 %v711_v52 }
 0x10b   : > { %473 = vmatmul.bf16.gmra.mxu3 %v713_v53 }
 0x11b   : > { %478 = vmatmul.bf16.gmra.mxu3 %v714_v54 }
 0x178   : > { %v464_v55 = vpop.f32.mrf.mxu1 }
 0x179   : > { %511 = vst [vmem:[%s227_s22] sm:$0xff] %v464_v55 }
 0x17e   : > { %v469_v56 = vpop.f32.mrf.mxu3 }
 0x17f   : > { %513 = vst [vmem:[%s227_s22 + $0x10] sm:$0xff] %v469_v56 }
 0x180   : > { %v466_v57 = vpop.f32.mrf.mxu1 }
 0x181   : > { %512 = vst [vmem:[%s227_s22 + $0x8] sm:$0xff] %v466_v57 }
 0x186   : > { %v471_v58 = vpop.f32.mrf.mxu3 }
 0x187   : > { %514 = vst [vmem:[%s227_s22 + $0x18] sm:$0xff] %v471_v58 }
 0x18e   : > { %v474_v59 = vpop.f32.mrf.mxu3 }
 0x18f   : > { %515 = vst [vmem:[%s227_s22 + $0x20] sm:$0xff] %v474_v59 }
 0x196   : > { %v476_v60 = vpop.f32.mrf.mxu3 }
 0x197   : > { %516 = vst [vmem:[%s227_s22 + $0x28] sm:$0xff] %v476_v60 }
 0x19e   : > { %v479_v61 = vpop.f32.mrf.mxu3 }
 0x19f   : > { %517 = vst [vmem:[%s227_s22 + $0x30] sm:$0xff] %v479_v61 }
 0x1a6   : > { %v481_v62 = vpop.f32.mrf.mxu3 }
 0x1a7   : > { %518 = vst [vmem:[%s227_s22 + $0x38] sm:$0xff] %v481_v62 }
 0x1a8   : > { %811 = shalt.err (!%p808_p5)
}
 0x1a9   : > { %s864_s14 = smov 128   ;;  %s865_s21 = smov 8  }
 0x1aa   : > { %726 = dma.vmem_to_hbm [thread:$0]  (%p931_p4), %s533_s5, 1024, %s535_s6, %s520_s7, %s864_s14, %s864_s14, %s865_s21  }
 0x1ab PF: > { %p732_p6 = scmp.ge.s32.totalorder %s862_s20, 2  ;;  %s549_s22 = sand.u32 1, %s842_s15  }
 0x1ac   : > { %s550_s24 = scalar_lea.sflag [#allocation4], %s549_s22 }
 0x1ad   : > { %p729_p7 = pnand %p732_p6, %p938_p8 }
 0x1af   : > { %p730_p9 = pneg %p729_p7 }
 0x1b1   : > { %837 = dma.done.wait (%p730_p9), %s550_s24, 1024  }
 0x1b2   : > { %839 = vsyncadd (%p730_p9), %s550_s24, 4294966272  ;;  %s17_s20 = sadd.s32 1, %s862_s20   ;;  %s1027_s15 = smov %s846_s16 }
 0x1b3   : > { %p14_p10 = scmp.ge.s32.totalorder %s17_s20, 4   ;;  %s1028_s16 = smov %s850_s17 }
 0x1b4   : > { %s1029_s17 = smov %s944_s28  ;;  %s1030_s18 = smov %s858_s19 }
 0x1b5   : > { %s1031_s19 = smov %s1033_s23  ;;  %16 = sbr.rel (!%p14_p10) target bundleno = 4 (0x4), region = 82 }
 0x1ba   :  { %556 = vsyncpa [#allocation4], 1 }
 0x1bb   :  { %558 = vsyncpa [#allocation4 + $0x1], 1 }

</bundles_post_ra>
